<compile_context>
chip_gen: v7x
topology: tpu7x:2x2x1
jax: 0.10.0
libtpu: 0.0.40
codegen_flags: <defaults>
</compile_context>

<pallas_src>
import functools

import jax
import jax.numpy as jnp
from jax.experimental import pallas as pl
from jax.experimental.pallas import tpu as pltpu


def _addcoords_kernel(x_ref, o_ref, *, C: int, H: int, W: int, with_r: bool):
    # Block shapes: x_ref (1, C, TS), o_ref (1, C_out, TS).
    TS = x_ref.shape[2]

    # 1) Stream the input channels through unchanged (lane-dense store).
    o_ref[0, :C, :] = x_ref[0, :, :]

    # 2) Coordinate channels for this spatial tile, derived from the flat
    #    index  idx = i*W + j  of the (H, W) plane.  Decomposition is done in
    #    f32 (exact for HW < 2^23; the +0.5 keeps floor robust at row
    #    boundaries), which avoids relying on vector integer div/mod.
    start = (pl.program_id(1) * TS).astype(jnp.float32)
    lane = jax.lax.broadcasted_iota(jnp.int32, (1, TS), 1).astype(jnp.float32)
    idx = lane + start                                  # (1, TS)
    w_f = jnp.float32(W)
    ii = jnp.floor((idx + 0.5) / w_f)                   # H index
    jj = idx - ii * w_f                                 # W index
    # Same op order as PyTorch: divide, *2, -1.
    xx = ii / jnp.float32(H - 1) * 2.0 - 1.0            # varies along H
    yy = jj / jnp.float32(W - 1) * 2.0 - 1.0            # varies along W

    rows = [xx, yy]
    if with_r:
        rows.append(jnp.sqrt((xx - 0.5) ** 2 + (yy - 0.5) ** 2))
    # Fuse the 2 (or 3) coordinate-channel writes into one contiguous store.
    coords = jnp.concatenate(rows, axis=0)              # (n_extra, TS)
    o_ref[0, C:, :] = coords.astype(o_ref.dtype)


def _spatial_tile(HW: int, C: int, C_out: int, itemsize: int) -> int:
    """Largest multiple-of-128 spatial tile keeping in+out blocks ~<= 4 MiB."""
    budget = 4 * 1024 * 1024                # bytes for one (in + out) block pair
    per_col = (C + C_out) * itemsize
    ts = (budget // per_col) // 128 * 128
    if ts <= 0:
        ts = 128                            # degenerate: extremely wide C
    if ts >= HW:
        return HW                           # full extent satisfies tiling rule
    return int(ts)


def add_coords(x: jax.Array, with_r: bool = False, *, tile_cols=None) -> jax.Array:
    """Pallas TPU implementation of AddCoords.forward (NCHW)."""
    B, C, H, W = x.shape
    n_extra = 3 if with_r else 2
    C_out = C + n_extra
    HW = H * W

    TS = tile_cols if tile_cols is not None else _spatial_tile(
        HW, C, C_out, jnp.dtype(x.dtype).itemsize)
    TS = min(TS, HW)

    x_flat = x.reshape(B, C, HW)            # free (contiguous) reshape
    kernel = functools.partial(_addcoords_kernel, C=C, H=H, W=W, with_r=with_r)

    out_flat = pl.pallas_call(
        kernel,
        out_shape=jax.ShapeDtypeStruct((B, C_out, HW), x.dtype),
        grid_spec=pltpu.PrefetchScalarGridSpec(
            num_scalar_prefetch=0,
            grid=(B, pl.cdiv(HW, TS)),
            in_specs=[pl.BlockSpec((1, C, TS), lambda b, s: (b, 0, s))],
            out_specs=pl.BlockSpec((1, C_out, TS), lambda b, s: (b, 0, s)),
        ),
        # Both axes are independent -> megacore shards across v7x's 2 TCs.
        # (Buffered(3) could be swept here if a trace shows exposed DMA.)
        compiler_params=pltpu.CompilerParams(
            dimension_semantics=("parallel", "parallel")),
    )(x_flat)

    return out_flat.reshape(B, C_out, H, W)


def _reference_add_coords(x: jnp.ndarray, with_r: bool = False) -> jnp.ndarray:
    """Pure-JAX reference mirroring the PyTorch semantics exactly."""
    B, C, H, W = x.shape
    ii = jnp.arange(H, dtype=jnp.float32)[:, None]  # (H, 1)
    jj = jnp.arange(W, dtype=jnp.float32)[None, :]  # (1, W)
    xx = (ii / (H - 1) * 2.0 - 1.0) * jnp.ones((H, W), jnp.float32)
    yy = (jj / (W - 1) * 2.0 - 1.0) * jnp.ones((H, W), jnp.float32)
    xx_b = jnp.broadcast_to(xx, (B, 1, H, W)).astype(x.dtype)
    yy_b = jnp.broadcast_to(yy, (B, 1, H, W)).astype(x.dtype)
    parts = [x, xx_b, yy_b]
    if with_r:
        rr = jnp.sqrt((xx_b - 0.5) ** 2 + (yy_b - 0.5) ** 2)
        parts.append(rr)
    return jnp.concatenate(parts, axis=1)


if __name__ == "__main__":
    key = jax.random.PRNGKey(0)
    B, C, H, W = 2, 4, 16, 16
    x = jax.random.normal(key, (B, C, H, W), dtype=jnp.float32)

    # with_r=False (module default), auto tile (single full-HW tile here).
    out = jax.block_until_ready(add_coords(x, with_r=False))
    ref = _reference_add_coords(x, with_r=False)
    assert out.shape == (B, C + 2, H, W), out.shape
    assert jnp.allclose(out, ref, atol=1e-6), "mismatch (with_r=False)"

    # Forced spatial tiling (HW=256 split into two 128-lane tiles) to exercise
    # the multi-step pipeline / coordinate decomposition across tiles.
    out_t = jax.block_until_ready(add_coords(x, with_r=False, tile_cols=128))
    assert jnp.allclose(out_t, ref, atol=1e-6), "mismatch (tiled)"

    # with_r=True path.
    out_r = jax.block_until_ready(add_coords(x, with_r=True))
    ref_r = _reference_add_coords(x, with_r=True)
    assert out_r.shape == (B, C + 3, H, W), out_r.shape
    assert jnp.allclose(out_r, ref_r, atol=1e-6), "mismatch (with_r=True)"

    print("KERNEL_OK")
</pallas_src>

<mosaic_0001>
module attributes {stable_mosaic.version = 11 : i64} {
  func.func @_addcoords_kernel(%arg0: i32, %arg1: i32, %arg2: memref<1x4x256xf32, #tpu.memory_space<vmem>>, %arg3: memref<1x6x256xf32, #tpu.memory_space<vmem>>) attributes {dimension_semantics = [#tpu.dimension_semantics<parallel>, #tpu.dimension_semantics<parallel>], iteration_bounds = array<i64: 2, 1>, scalar_prefetch = 0 : i64, scratch_operands = 0 : i64, tpu.core_type = #tpu.core_type<tc>, window_params = [{transform_indices = @transform_0, window_bounds = array<i64: 1, 4, 256>}, {transform_indices = @transform_1, window_bounds = array<i64: 1, 6, 256>}]} {
    %c0 = arith.constant 0 : index
    %c0_0 = arith.constant 0 : index
    %c0_1 = arith.constant 0 : index
    %0 = vector.load %arg2[%c0, %c0_0, %c0_1] : memref<1x4x256xf32, #tpu.memory_space<vmem>>, vector<1x4x256xf32>
    %1 = vector.shape_cast %0 : vector<1x4x256xf32> to vector<4x256xf32>
    %c0_2 = arith.constant 0 : index
    %c0_3 = arith.constant 0 : index
    %c0_4 = arith.constant 0 : index
    %2 = vector.load %arg3[%c0_2, %c0_3, %c0_4] : memref<1x6x256xf32, #tpu.memory_space<vmem>>, vector<1x4x256xf32>
    %3 = vector.shape_cast %2 : vector<1x4x256xf32> to vector<4x256xf32>
    %4 = vector.shape_cast %1 : vector<4x256xf32> to vector<1x4x256xf32>
    tpu.vector_store %arg3[%c0_2, %c0_3, %c0_4], %4 {strides = array<i32>} : memref<1x6x256xf32, #tpu.memory_space<vmem>>, vector<1x4x256xf32>,
    %c256_i32 = arith.constant 256 : i32
    %5 = arith.muli %arg1, %c256_i32 : i32
    %6 = arith.sitofp %5 : i32 to f32
    %7 = tpu.iota {dimensions = array<i32: 1>} : vector<1x256xi32>
    %8 = arith.sitofp %7 : vector<1x256xi32> to vector<1x256xf32>
    %9 = vector.broadcast %6 : f32 to vector<1x256xf32>
    %10 = arith.addf %8, %9 : vector<1x256xf32>
    %cst = arith.constant 5.000000e-01 : f32
    %11 = vector.broadcast %cst : f32 to vector<1x256xf32>
    %12 = arith.addf %10, %11 : vector<1x256xf32>
    %cst_5 = arith.constant 1.600000e+01 : f32
    %13 = vector.broadcast %cst_5 : f32 to vector<1x256xf32>
    %14 = arith.divf %12, %13 : vector<1x256xf32>
    %15 = math.floor %14 : vector<1x256xf32>
    %cst_6 = arith.constant 1.600000e+01 : f32
    %16 = vector.broadcast %cst_6 : f32 to vector<1x256xf32>
    %17 = arith.mulf %15, %16 : vector<1x256xf32>
    %18 = arith.subf %10, %17 : vector<1x256xf32>
    %cst_7 = arith.constant 1.500000e+01 : f32
    %19 = vector.broadcast %cst_7 : f32 to vector<1x256xf32>
    %20 = arith.divf %15, %19 : vector<1x256xf32>
    %cst_8 = arith.constant 2.000000e+00 : f32
    %21 = vector.broadcast %cst_8 : f32 to vector<1x256xf32>
    %22 = arith.mulf %20, %21 : vector<1x256xf32>
    %cst_9 = arith.constant 1.000000e+00 : f32
    %23 = vector.broadcast %cst_9 : f32 to vector<1x256xf32>
    %24 = arith.subf %22, %23 : vector<1x256xf32>
    %cst_10 = arith.constant 1.500000e+01 : f32
    %25 = vector.broadcast %cst_10 : f32 to vector<1x256xf32>
    %26 = arith.divf %18, %25 : vector<1x256xf32>
    %cst_11 = arith.constant 2.000000e+00 : f32
    %27 = vector.broadcast %cst_11 : f32 to vector<1x256xf32>
    %28 = arith.mulf %26, %27 : vector<1x256xf32>
    %cst_12 = arith.constant 1.000000e+00 : f32
    %29 = vector.broadcast %cst_12 : f32 to vector<1x256xf32>
    %30 = arith.subf %28, %29 : vector<1x256xf32>
    %31 = tpu.concatenate %24, %30 in 0 : vector<1x256xf32>, vector<1x256xf32> -> vector<2x256xf32>
    %c0_13 = arith.constant 0 : index
    %c4 = arith.constant 4 : index
    %c0_14 = arith.constant 0 : index
    %32 = vector.load %arg3[%c0_13, %c4, %c0_14] : memref<1x6x256xf32, #tpu.memory_space<vmem>>, vector<1x2x256xf32>
    %33 = vector.shape_cast %32 : vector<1x2x256xf32> to vector<2x256xf32>
    %34 = vector.shape_cast %31 : vector<2x256xf32> to vector<1x2x256xf32>
    tpu.vector_store %arg3[%c0_13, %c4, %c0_14], %34 {strides = array<i32>} : memref<1x6x256xf32, #tpu.memory_space<vmem>>, vector<1x2x256xf32>,
    return
  }
  func.func @transform_0(%arg0: i32, %arg1: i32) -> (i32, i32, i32) {
    %c0_i32 = arith.constant 0 : i32
    %c0_i32_0 = arith.constant 0 : i32
    return %arg0, %c0_i32, %arg1 : i32, i32, i32
  }
  func.func @transform_1(%arg0: i32, %arg1: i32) -> (i32, i32, i32) {
    %c0_i32 = arith.constant 0 : i32
    %c0_i32_0 = arith.constant 0 : i32
    return %arg0, %c0_i32, %arg1 : i32, i32, i32
  }
}

</mosaic_0001>

<bundles_post_ra>
// kernel: tpu_custom_call.1
= control target key start
LH: loop header
LB: loop body
LE: loop exit
PB: predicated region body
PF: predicated region fallthrough
CT: control target
= control target key end

     0   :  { %6 = vsyncpa [#allocation3], 0  ;;  %s608_s0 = inlined_call_operand.hbm [shape: f32[2,4,256], index: 0, kind: input, shape index: {}]   ;;  %s609_s1 = inlined_call_operand.vmem [shape: f32[2,6,256], index: 1, kind: output, shape index: {}]  }
   0x1   :  { %8 = vsyncpa [#allocation3 + $0x1], 0  ;;  %s477_s6 = smov 0   ;;  %s479_s7 = smov 0  }
   0x2   :  { %s481_s8 = smov 0   ;;  %s483_s9 = smov 0  }
   0x3   :  { %s485_s10 = smov 0   ;;  %s487_s11 = smov 0  }
   0x4 LB: > { %s309_s12 = sadd.s32 4294967295, %s464_s11   ;;  %s26_s13 = sadd.s32 1, %s460_s10  ;;  %s464_s11 = sphi %s487_s11, %s14_s11   ;;  %s460_s10 = sphi %s485_s10, %s619_s10   ;;  %s456_s9 = sphi %s483_s9, %s618_s9   ;;  %s452_s8 = sphi %s481_s8, %s617_s8   ;;  %s448_s7 = sphi %s479_s7, %s616_s7   ;;  %s444_s6 = sphi %s477_s6, %s615_s6  }
   0x5   : > { %p28_p0 = scmp.ge.s32.totalorder %s26_s13, 2  ;;  %s35_s14 = sadd.s32 1, %s452_s8 }
   0x6   : > { %p42_p1 = scmp.ne.s32.totalorder %s452_s8, %s448_s7  ;;  %p43_p2 = scmp.eq.s32.totalorder %s464_s11, 0 }
   0x7   : > { %s621_s13 = smov (%p28_p0, %s26_s13), 0  ;;  %p48_p4 = scmp.ne.s32.totalorder %s448_s7, %s444_s6 }
   0x8   : > { %p513_p3 = por %p43_p2, %p42_p1  ;;  %s30_s16 = ssub.s32 %s460_s10, %s621_s13 }
   0x9   : > { %p49_p5 = scmp.eq.s32.totalorder %s309_s12, 0  ;;  %p33_p6 = scmp.eq.s32.totalorder %s30_s16, 0 }
   0xa   : > { %p334_p8 = scmp.lt.s32.totalorder %s464_s11, 2  ;;  %s100_s19 = sand.u32 1, %s452_s8  }
   0xb   : > { %p520_p7 = por %p49_p5, %p48_p4  ;;  %s326_s20 = sshll.u32 %s460_s10, 7 }
   0xc   : > { %s526_s18 = scalar_select %p33_p6, %s452_s8, %s35_s14  }
   0xd   : > { %s313_s21 = sshll.u32 %s100_s19, 3  ;;  %s533_s24 = scalar_lea.hbm %s608_s0, %s326_s20 }
   0xe   : > { %s104_s25 = scalar_lea.vmem [#allocation2], %s313_s21  ;;  %p537_p9 = pnand %p334_p8, %p513_p3 }
   0xf   : > { %s114_s26 = sshll.u32 %s104_s25, 4  ;;  %s101_s28 = scalar_lea.sflag [#allocation3], %s100_s19  ;;  %s541_s26 = int_to_ptr.vmem [resolvable:$true] %s114_s26 }
  0x10   : > { %s384_s29 = scalar_lea.hbm %s533_s24, 128  ;;  %p386_p13 = pneg %p537_p9 }
  0x11   : > { %p385_p12 = scmp.ne.s32.totalorder %s533_s24, %s384_s29  ;;  %s389_s3 = scalar_lea.hbm %s608_s0, 256 }
  0x12   : > { %p390_p2 = scmp.lt.u32.totalorder %s533_s24, %s608_s0  ;;  %p391_p3 = scmp.lt.u32.totalorder %s389_s3, %s384_s29 }
  0x13   : > { %p387_p0 = pnand %p386_p13, %p385_p12  ;;  %p393_p5 = scmp.lt.u32.totalorder %s384_s29, %s533_s24 }
  0x14   : > { %p392_p4 = por %p391_p3, %p390_p2 }
  0x15   : > { %p388_p1 = pneg %p387_p0 }
  0x16   : > { %p394_p6 = por %p393_p5, %p392_p4 }
  0x18   : > { %p395_p8 = pnand %p394_p6, %p388_p1 }
  0x1a   : > { %398 = shalt.err (!%p395_p8)
}
  0x1b   : > { %s399_s6 = scalar_lea.vmem %s541_s26, 128  ;;  %s466_s12 = smov [#allocation2]  }
  0x1c   : > { %p400_p12 = scmp.ne.s32.totalorder %s541_s26, %s399_s6  ;;  %s404_s14 = sshll.u32 %s466_s12, 4  ;;  %s405_s14 = int_to_ptr.vmem [resolvable:$false] %s404_s14 }
  0x1d   : > { %s406_s15 = scalar_lea.vmem %s405_s14, 256  ;;  %p407_p11 = scmp.lt.s32.totalorder %s541_s26, %s405_s14 }
  0x1e   : > { %p402_p0 = pnand %p400_p12, %p386_p13  ;;  %p408_p2 = scmp.lt.s32.totalorder %s406_s15, %s399_s6 }
  0x20   : > { %p403_p10 = pneg %p402_p0  ;;  %p409_p3 = por %p408_p2, %p407_p11 }
  0x22   : > { %p410_p4 = pnand %p409_p3, %p403_p10 }
  0x24   : > { %413 = shalt.err (!%p410_p4)
}
  0x25   : > { %333 = dma.hbm_to_vmem [thread:$0]  (!%p537_p9), %s533_s24, 128, %s541_s26, %s101_s28  }
  0x26   : > { %p613_p1 = scmp.lt.s32.totalorder %s464_s11, 3  ;;  %p614_p5 = scmp.ge.s32.totalorder %s464_s11, 1 }
  0x28   : > { %p120_p13 = pnand %p614_p5, %p613_p1 }
  0x29   : > { %s125_s16 = sand.u32 (!%p120_p13), 1, %s448_s7  }
  0x2a   : > { %123 = sbr.rel (%p120_p13) target bundleno = 78 (0x4e), region = 24  ;;  %s317_s19 = sshll.u32 (!%p120_p13), %s125_s16, 3 }
  0x2b   : > { %s126_s20 = scalar_lea.sflag (!%p120_p13), [#allocation3], %s125_s16  ;;  %s129_s21 = scalar_lea.vmem (!%p120_p13), [#allocation2], %s317_s19 }
  0x31   : > { %439 = dma.done.wait (%p520_p7), %s126_s20, 128  }
  0x32   : > { %441 = vsyncadd (%p520_p7), %s126_s20, 4294967168  ;;  %p154_p10 = scmp.lt.s32.totalorder %s456_s9, 1  ;;  %v171_v0 = vlaneseq  ;;  %v163_v6 = vld [vmem:[%s129_s21] sm:$0xff]  ;;  %vm203_vm0 = vcmask 1040384  }
  0x33   : > { %v165_v7 = vcombine.high %v163_v6, %v163_v6 }
  0x34   : > { %s623_s9 = smov (!%p154_p10, %s456_s9), 1  ;;  %v172_v1 = vand.u32 127, %v171_v0 }
  0x35   : > { %s327_s22 = sshll.u32 %s623_s9, 4 }
  0x36   : > { %v174_v2 = vcvt.s32.f32 %v172_v1  ;;  %v173_v3 = vadd.s32 128, %v172_v1  ;;  %s584_s25 = scalar_lea.vmem %s609_s1, %s327_s22 }
  0x37   : > { %167 = vst [vmem:[%s584_s25] sm:$0xf] %v163_v6  ;;  %168 = vst [vmem:[%s584_s25 + $0x8] sm:$0xf] %v165_v7 }
  0x38   : > { %v179_v4 = vadd.f32 0.5, %v174_v2  ;;  %v175_v5 = vcvt.s32.f32 %v173_v3 }
  0x3a   : > { %v182_v8 = vmul.f32 0.0625, %v179_v4  ;;  %v180_v9 = vadd.f32 0.5, %v175_v5 }
  0x3c   : > { %v184_v10 = vfloor.f32 %v182_v8  ;;  %v183_v11 = vmul.f32 0.0625, %v180_v9 }
  0x3e   : > { %v186_v12 = vmul.f32 16.0, %v184_v10  ;;  %v191_v13 = vmul.f32 0.06666667, %v184_v10  ;;  %v185_v14 = vfloor.f32 %v183_v11 }
  0x40   : > { %v188_v15 = vsub.f32 %v174_v2, %v186_v12  ;;  %v193_v16 = vmul.f32 2.0, %v191_v13  ;;  %v187_v17 = vmul.f32 16.0, %v185_v14  ;;  %v192_v18 = vmul.f32 0.06666667, %v185_v14 }
  0x42   : > { %v197_v19 = vmul.f32 0.06666667, %v188_v15  ;;  %v189_v20 = vsub.f32 %v175_v5, %v187_v17  ;;  %v194_v21 = vmul.f32 2.0, %v192_v18  ;;  %v320_v22 = vadd.f32 -1.0, %v193_v16 }
  0x44   : > { %v199_v23 = vmul.f32 2.0, %v197_v19  ;;  %v198_v24 = vmul.f32 0.06666667, %v189_v20  ;;  %v321_v26 = vadd.f32 -1.0, %v194_v21 }
  0x46   : > { %v322_v25 = vadd.f32 -1.0, %v199_v23  ;;  %v200_v27 = vmul.f32 2.0, %v198_v24 }
  0x48   : > { %v204_v28 = vsel %vm203_vm0, %v320_v22, %v322_v25  ;;  %v323_v29 = vadd.f32 -1.0, %v200_v27 }
  0x49   : > { %v208_v30 = vrot.slane %v204_v28, 4 }
  0x4a   : > { %v205_v31 = vsel %vm203_vm0, %v321_v26, %v323_v29 }
  0x4b   : > { %212 = vst [vmem:[%s584_s25] sm:$0x30] %v208_v30  ;;  %v209_v32 = vrot.slane %v205_v31, 4 }
  0x4d   : > { %213 = vst [vmem:[%s584_s25 + $0x8] sm:$0x30] %v209_v32 }
  0x4e PF: > { %s14_s11 = sadd.s32 1, %s464_s11   ;;  %s615_s6 = smov %s448_s7 }
  0x4f   : > { %p11_p7 = scmp.ge.s32.totalorder %s14_s11, 4   ;;  %s616_s7 = smov %s452_s8 }
  0x50   : > { %s617_s8 = smov %s526_s18  ;;  %s618_s9 = smov %s460_s10 }
  0x51   : > { %s619_s10 = smov %s621_s13  ;;  %13 = sbr.rel (!%p11_p7) target bundleno = 4 (0x4), region = 64 }
  0x58   :  { %244 = vsyncpa [#allocation3], 1 }
  0x59   :  { %246 = vsyncpa [#allocation3 + $0x1], 1 }

</bundles_post_ra>
